<compile_context>
chip_gen: v6e
topology: v6e:2x2x1
jax: 0.10.0
libtpu: 0.0.40
codegen_flags: <defaults>
</compile_context>

<pallas_src>
import jax
import jax.numpy as jnp
from jax.experimental import pallas as pl
from jax.experimental.pallas import tpu as pltpu

IN_DIM = 16
HID_DIM = 64
ACT_DIM = 2
OUT_PAD = 128        # lane-dense output slab width (one full vreg lane row)
TILE_B_MAX = 128     # per-step batch tile; matches MXU native height


def _round_up(n, m):
    return (n + m - 1) // m * m


def actor_critic_kernel(x_ref, ws_ref, bs_ref, wh_ref, bh_ref, out_ref):
    # shared layer + ReLU (MXU matmul, f32 accumulate)
    h = jnp.dot(x_ref[...], ws_ref[...], preferred_element_type=jnp.float32) + bs_ref[...]
    h = jnp.maximum(h, 0.0)

    # fused head: cols 0-1 = actor-mean pre-activation, col 2 = value,
    # cols 3..127 = zero padding.  One MXU push/drain instead of two.
    z = jnp.dot(h, wh_ref[...], preferred_element_type=jnp.float32) + bh_ref[...]

    # single tanh serves both squashings: sigmoid(a) = 0.5 * (tanh(a / 2) + 1)
    col = jax.lax.broadcasted_iota(jnp.int32, z.shape, 1)
    t = jnp.tanh(jnp.where(col == 0, 0.5 * z, z))
    squashed = jnp.where(col == 0, 0.5 * (t + 1.0), t)

    # cols 0-1: squashed mean, col 2: raw value, cols >= 3: pass-through zeros.
    out_ref[...] = jnp.where(col < ACT_DIM, squashed, z)


def actor_critic_forward(x, params):
    """x: [B, 16] float32. Returns (action_mean [B,2], action_std [2], value [B,1])."""
    B = x.shape[0]
    w_s, b_s, w_m, b_m, w_c, b_c, log_std = params

    # Fuse actor-mean + critic into one lane-dense [64, 128] head weight.
    w_h = jnp.zeros((HID_DIM, OUT_PAD), jnp.float32)
    w_h = w_h.at[:, :ACT_DIM].set(w_m).at[:, ACT_DIM].set(w_c[:, 0])
    b_h = jnp.zeros((1, OUT_PAD), jnp.float32)
    b_h = b_h.at[0, :ACT_DIM].set(b_m).at[0, ACT_DIM].set(b_c[0])
    b_s2 = b_s.reshape(1, HID_DIM)

    # Batch tiling: pad B to a multiple of the tile; grid streams x while the
    # (tiny) weights stay VMEM-resident via constant index_maps.
    tile_b = min(TILE_B_MAX, _round_up(max(B, 1), 8))
    Bp = _round_up(B, tile_b)
    xp = jnp.pad(x, ((0, Bp - B), (0, 0))) if Bp != B else x

    out = pl.pallas_call(
        actor_critic_kernel,
        out_shape=jax.ShapeDtypeStruct((Bp, OUT_PAD), jnp.float32),
        grid=(Bp // tile_b,),
        in_specs=[
            pl.BlockSpec((tile_b, IN_DIM), lambda i: (i, 0)),    # x: streamed tiles
            pl.BlockSpec((IN_DIM, HID_DIM), lambda i: (0, 0)),   # weights: resident
            pl.BlockSpec((1, HID_DIM), lambda i: (0, 0)),
            pl.BlockSpec((HID_DIM, OUT_PAD), lambda i: (0, 0)),
            pl.BlockSpec((1, OUT_PAD), lambda i: (0, 0)),
        ],
        out_specs=pl.BlockSpec((tile_b, OUT_PAD), lambda i: (i, 0)),
        compiler_params=pltpu.CompilerParams(
            dimension_semantics=("parallel",)),                  # 2nd TC on v7x
    )(xp, w_s, b_s2, w_h, b_h)

    action_mean = out[:B, :ACT_DIM]
    value = out[:B, ACT_DIM:ACT_DIM + 1]
    action_std = jnp.exp(log_std)   # batch-independent: hoisted out of the kernel
    return action_mean, action_std, value


def init_params(key):
    """Deterministic PyTorch-style Linear init (uniform +/- 1/sqrt(fan_in))."""
    ks = jax.random.split(key, 6)

    def lin(kw, kb, fan_in, fan_out):
        bound = 1.0 / jnp.sqrt(fan_in)
        w = jax.random.uniform(kw, (fan_in, fan_out), jnp.float32, -bound, bound)
        b = jax.random.uniform(kb, (fan_out,), jnp.float32, -bound, bound)
        return w, b

    w_s, b_s = lin(ks[0], ks[1], IN_DIM, HID_DIM)
    w_m, b_m = lin(ks[2], ks[3], HID_DIM, ACT_DIM)
    w_c, b_c = lin(ks[4], ks[5], HID_DIM, 1)
    log_std = jnp.zeros((ACT_DIM,), jnp.float32)   # nn.Parameter(torch.zeros(2))
    return (w_s, b_s, w_m, b_m, w_c, b_c, log_std)


def _reference(x, params):
    w_s, b_s, w_m, b_m, w_c, b_c, log_std = params
    h = jnp.maximum(x @ w_s + b_s, 0.0)
    value = h @ w_c + b_c
    am = h @ w_m + b_m
    am = jnp.stack([jax.nn.sigmoid(am[:, 0]), jnp.tanh(am[:, 1])], axis=1)
    return am, jnp.exp(log_std), value


# TODO(synk): discrete-action branch (use_continuous_actions=False, softmax over 6
# actions) is a config variant of the module and is not implemented here.

if __name__ == "__main__":
    key = jax.random.PRNGKey(0)
    k_param, k_x1, k_x2 = jax.random.split(key, 3)
    params = init_params(k_param)

    # small batch (module-typical) and a larger ragged batch that exercises the
    # multi-step grid + padding path.
    for B, kx in ((8, k_x1), (260, k_x2)):
        x = jax.random.normal(kx, (B, IN_DIM), jnp.float32)
        mean, std, value = actor_critic_forward(x, params)
        jax.block_until_ready((mean, std, value))

        ref_mean, ref_std, ref_value = _reference(x, params)
        assert mean.shape == (B, ACT_DIM) and std.shape == (ACT_DIM,) and value.shape == (B, 1)
        assert jnp.allclose(mean, ref_mean, atol=1e-5, rtol=1e-5)
        assert jnp.allclose(std, ref_std, atol=1e-6)
        assert jnp.allclose(value, ref_value, atol=1e-5, rtol=1e-5)

    print("KERNEL_OK")
</pallas_src>

<mosaic_0001>
module attributes {stable_mosaic.version = 11 : i64} {
  func.func @actor_critic_kernel(%arg0: i32, %arg1: memref<8x16xf32, #tpu.memory_space<vmem>>, %arg2: memref<16x64xf32, #tpu.memory_space<vmem>>, %arg3: memref<1x64xf32, #tpu.memory_space<vmem>>, %arg4: memref<64x128xf32, #tpu.memory_space<vmem>>, %arg5: memref<1x128xf32, #tpu.memory_space<vmem>>, %arg6: memref<8x128xf32, #tpu.memory_space<vmem>>) attributes {dimension_semantics = [#tpu.dimension_semantics<parallel>], iteration_bounds = array<i64: 1>, scalar_prefetch = 0 : i64, scratch_operands = 0 : i64, tpu.core_type = #tpu.core_type<tc>, window_params = [{transform_indices = @transform_0, window_bounds = array<i64: 8, 16>}, {pipeline_mode = #tpu.pipeline_mode<synchronous>, transform_indices = @transform_1, window_bounds = array<i64: 16, 64>}, {pipeline_mode = #tpu.pipeline_mode<synchronous>, transform_indices = @transform_2, window_bounds = array<i64: 1, 64>}, {pipeline_mode = #tpu.pipeline_mode<synchronous>, transform_indices = @transform_3, window_bounds = array<i64: 64, 128>}, {pipeline_mode = #tpu.pipeline_mode<synchronous>, transform_indices = @transform_4, window_bounds = array<i64: 1, 128>}, {transform_indices = @transform_5, window_bounds = array<i64: 8, 128>}]} {
    %c0 = arith.constant 0 : index
    %c0_0 = arith.constant 0 : index
    %0 = vector.load %arg1[%c0, %c0_0] : memref<8x16xf32, #tpu.memory_space<vmem>>, vector<8x16xf32>
    %c0_1 = arith.constant 0 : index
    %c0_2 = arith.constant 0 : index
    %1 = vector.load %arg2[%c0_1, %c0_2] : memref<16x64xf32, #tpu.memory_space<vmem>>, vector<16x64xf32>
    %cst = arith.constant dense<0.000000e+00> : vector<8x64xf32>
    %2 = tpu.matmul %0, %1, %cst {dimension_numbers = #tpu.dot_dimension_numbers<[1], [0], [0], [1], [0, 0, 1, 1], [], []>} : vector<8x16xf32>, vector<16x64xf32>, vector<8x64xf32> -> vector<8x64xf32>
    %c0_3 = arith.constant 0 : index
    %c0_4 = arith.constant 0 : index
    %3 = vector.load %arg3[%c0_3, %c0_4] : memref<1x64xf32, #tpu.memory_space<vmem>>, vector<1x64xf32>
    %4 = vector.broadcast %3 : vector<1x64xf32> to vector<8x64xf32>
    %5 = arith.addf %2, %4 : vector<8x64xf32>
    %cst_5 = arith.constant 0.000000e+00 : f32
    %6 = vector.broadcast %cst_5 : f32 to vector<8x64xf32>
    %7 = arith.maximumf %5, %6 : vector<8x64xf32>
    %c0_6 = arith.constant 0 : index
    %c0_7 = arith.constant 0 : index
    %8 = vector.load %arg4[%c0_6, %c0_7] : memref<64x128xf32, #tpu.memory_space<vmem>>, vector<64x128xf32>
    %cst_8 = arith.constant dense<0.000000e+00> : vector<8x128xf32>
    %9 = tpu.matmul %7, %8, %cst_8 {dimension_numbers = #tpu.dot_dimension_numbers<[1], [0], [0], [1], [0, 0, 1, 1], [], []>} : vector<8x64xf32>, vector<64x128xf32>, vector<8x128xf32> -> vector<8x128xf32>
    %c0_9 = arith.constant 0 : index
    %c0_10 = arith.constant 0 : index
    %10 = vector.load %arg5[%c0_9, %c0_10] : memref<1x128xf32, #tpu.memory_space<vmem>>, vector<1x128xf32>
    %11 = vector.broadcast %10 : vector<1x128xf32> to vector<8x128xf32>
    %12 = arith.addf %9, %11 : vector<8x128xf32>
    %13 = tpu.iota {dimensions = array<i32: 1>} : vector<8x128xi32>
    %c0_i32 = arith.constant 0 : i32
    %14 = vector.broadcast %c0_i32 : i32 to vector<8x128xi32>
    %15 = arith.cmpi eq, %13, %14 : vector<8x128xi32>
    %cst_11 = arith.constant 5.000000e-01 : f32
    %16 = vector.broadcast %cst_11 : f32 to vector<8x128xf32>
    %17 = arith.mulf %16, %12 : vector<8x128xf32>
    %18 = arith.select %15, %17, %12 : vector<8x128xi1>, vector<8x128xf32>
    %19 = math.tanh %18 : vector<8x128xf32>
    %c0_i32_12 = arith.constant 0 : i32
    %20 = vector.broadcast %c0_i32_12 : i32 to vector<8x128xi32>
    %21 = arith.cmpi eq, %13, %20 : vector<8x128xi32>
    %cst_13 = arith.constant 1.000000e+00 : f32
    %22 = vector.broadcast %cst_13 : f32 to vector<8x128xf32>
    %23 = arith.addf %19, %22 : vector<8x128xf32>
    %cst_14 = arith.constant 5.000000e-01 : f32
    %24 = vector.broadcast %cst_14 : f32 to vector<8x128xf32>
    %25 = arith.mulf %24, %23 : vector<8x128xf32>
    %26 = arith.select %21, %25, %19 : vector<8x128xi1>, vector<8x128xf32>
    %c2_i32 = arith.constant 2 : i32
    %27 = vector.broadcast %c2_i32 : i32 to vector<8x128xi32>
    %28 = arith.cmpi slt, %13, %27 : vector<8x128xi32>
    %29 = arith.select %28, %26, %12 : vector<8x128xi1>, vector<8x128xf32>
    %c0_15 = arith.constant 0 : index
    %c0_16 = arith.constant 0 : index
    %30 = vector.load %arg6[%c0_15, %c0_16] : memref<8x128xf32, #tpu.memory_space<vmem>>, vector<8x128xf32>
    tpu.vector_store %arg6[%c0_15, %c0_16], %29 {strides = array<i32>} : memref<8x128xf32, #tpu.memory_space<vmem>>, vector<8x128xf32>,
    return
  }
  func.func @transform_0(%arg0: i32) -> (i32, i32) {
    %c0_i32 = arith.constant 0 : i32
    %c0_i32_0 = arith.constant 0 : i32
    return %arg0, %c0_i32 : i32, i32
  }
  func.func @transform_1(%arg0: i32) -> (i32, i32) {
    %c0_i32 = arith.constant 0 : i32
    %c0_i32_0 = arith.constant 0 : i32
    %c0_i32_1 = arith.constant 0 : i32
    return %c0_i32, %c0_i32_0 : i32, i32
  }
  func.func @transform_2(%arg0: i32) -> (i32, i32) {
    %c0_i32 = arith.constant 0 : i32
    %c0_i32_0 = arith.constant 0 : i32
    %c0_i32_1 = arith.constant 0 : i32
    return %c0_i32, %c0_i32_0 : i32, i32
  }
  func.func @transform_3(%arg0: i32) -> (i32, i32) {
    %c0_i32 = arith.constant 0 : i32
    %c0_i32_0 = arith.constant 0 : i32
    %c0_i32_1 = arith.constant 0 : i32
    return %c0_i32, %c0_i32_0 : i32, i32
  }
  func.func @transform_4(%arg0: i32) -> (i32, i32) {
    %c0_i32 = arith.constant 0 : i32
    %c0_i32_0 = arith.constant 0 : i32
    %c0_i32_1 = arith.constant 0 : i32
    return %c0_i32, %c0_i32_0 : i32, i32
  }
  func.func @transform_5(%arg0: i32) -> (i32, i32) {
    %c0_i32 = arith.constant 0 : i32
    %c0_i32_0 = arith.constant 0 : i32
    return %arg0, %c0_i32 : i32, i32
  }
}

</mosaic_0001>

<bundles_post_ra>
// kernel: tpu_custom_call.1
= control target key start
LH: loop header
LB: loop body
LE: loop exit
PB: predicated region body
PF: predicated region fallthrough
CT: control target
= control target key end

     0   :  { %10 = vsyncpa [#allocation3], 0  ;;  %s456_s0 = inlined_call_operand.hbm [shape: f32[8,16], index: 0, kind: input, shape index: {}]   ;;  %s457_s1 = inlined_call_operand.hbm [shape: f32[16,64], index: 1, kind: input, shape index: {}]   ;;  %s458_s2 = inlined_call_operand.vmem [shape: f32[1,64], index: 2, kind: input, shape index: {}]   ;;  %s459_s3 = inlined_call_operand.hbm [shape: f32[64,128], index: 3, kind: input, shape index: {}]   ;;  %s460_s4 = inlined_call_operand.vmem [shape: f32[1,128], index: 4, kind: input, shape index: {}]   ;;  %s461_s5 = inlined_call_operand.hbm [shape: f32[8,128], index: 5, kind: output, shape index: {}]  }
   0x1   :  { %11 = vsyncpa [#allocation6], 0 }
   0x2   :  { %12 = vsyncpa [#allocation4], 0  ;;  %s400_s18 = smov [#allocation5]  }
   0x3   :  { %s28_s19 = sshll.u32 %s400_s18, 4  ;;  %s29_s19 = int_to_ptr.vmem [resolvable:$true] %s28_s19 }
   0x4   :  { %s322_s20 = scalar_lea.vmem %s29_s19, 256  ;;  %p327_p1 = scmp.lt.s32.totalorder %s29_s19, %s29_s19 }
   0x5   :  { %p323_p0 = scmp.ne.s32.totalorder %s29_s19, %s322_s20  ;;  %p328_p2 = scmp.lt.s32.totalorder %s322_s20, %s322_s20 }
   0x7   :  { %p329_p3 = por %p328_p2, %p327_p1 }
   0x9   :  { %p330_p4 = pnand %p329_p3, %p323_p0 }
   0xb   :  { %333 = shalt.err (!%p330_p4)
}
   0xc   :  { %s401_s21 = smov 128   ;;  %s402_s22 = smov 8  }
   0xd   :  { %34 = dma.hbm_to_vmem [thread:$0]  %s457_s1, 256, %s29_s19, [#allocation6], %s401_s21, %s401_s21, %s402_s22  }
   0xe   :  { %s403_s25 = smov [#allocation2]   ;;  %s404_s27 = smov [#allocation7]  }
   0xf   :  { %s19_s26 = sshll.u32 %s403_s25, 4  ;;  %s42_s28 = sshll.u32 %s404_s27, 4  ;;  %s20_s26 = int_to_ptr.vmem [resolvable:$true] %s19_s26  ;;  %s43_s28 = int_to_ptr.vmem [resolvable:$true] %s42_s28 }
  0x10   :  { %s342_s29 = scalar_lea.vmem %s20_s26, 128  ;;  %p347_p6 = scmp.lt.s32.totalorder %s20_s26, %s20_s26 }
  0x11   :  { %p343_p5 = scmp.ne.s32.totalorder %s20_s26, %s342_s29  ;;  %p348_p7 = scmp.lt.s32.totalorder %s342_s29, %s342_s29 }
  0x13   :  { %p349_p8 = por %p348_p7, %p347_p6 }
  0x15   :  { %p350_p9 = pnand %p349_p8, %p343_p5 }
  0x17   :  { %353 = shalt.err (!%p350_p9)
}
  0x18   :  { %22 = dma.hbm_to_vmem [thread:$0]  %s456_s0, 128, %s20_s26, [#allocation3]  }
  0x19   :  { %s362_s7 = scalar_lea.vmem %s43_s28, 1024  ;;  %p367_p11 = scmp.lt.s32.totalorder %s43_s28, %s43_s28 }
  0x1a   :  { %p363_p10 = scmp.ne.s32.totalorder %s43_s28, %s362_s7  ;;  %p368_p12 = scmp.lt.s32.totalorder %s362_s7, %s362_s7 }
  0x1c   :  { %p369_p13 = por %p368_p12, %p367_p11 }
  0x1e   :  { %p370_p0 = pnand %p369_p13, %p363_p10 }
  0x20   :  { %373 = shalt.err (!%p370_p0)
}
  0x21   :  { %48 = dma.hbm_to_vmem [thread:$0]  %s459_s3, 1024, %s43_s28, [#allocation6], %s401_s21, %s401_s21, %s402_s22  }
  0x22   :  { %394 = dma.done.wait [#allocation3], 128  }
  0x23   :  { %395 = vsyncadd [#allocation3], 4294967168 }
  0x24   :  { %396 = dma.done.wait [#allocation6], 1280  }
  0x25   :  { %397 = vsyncadd [#allocation6], 4294966016  ;;  %v405_v0 = vmov 0.0   ;;  %vm406_vm0 = vmmov 0   ;;  %v62_v1 = vld [vmem:[#allocation5 + $0x8] sm:$0xff]  ;;  %v61_v2 = vld [vmem:[#allocation5] sm:$0xff]  ;;  %v234_v17 = vlaneseq }
  0x26   :  { %278 = vmatprep.subr.mxu0 %v405_v0  ;;  %282 = vmatprep.mubr.msk.f32.mxu0 %vm406_vm0, %v405_v0  ;;  %v60_v3 = vld [vmem:[#allocation2] sm:$0xff]  ;;  %vm70_vm1 = vcmask 130048   ;;  %v152_v4 = vld [vmem:[#allocation7 + $0x38] sm:$0xff]  ;;  %v151_v5 = vld [vmem:[#allocation7 + $0x30] sm:$0xff]  ;;  %vm160_vm2 = vcmask 523264  }
  0x27   :  { %285 = vmatprep.subr.mxu1 %v405_v0  ;;  %301 = vmatprep.mubr.msk.f32.mxu1 %vm406_vm0, %v405_v0  ;;  %v150_v6 = vld [vmem:[#allocation7 + $0x28] sm:$0xff]  ;;  %v149_v7 = vld [vmem:[#allocation7 + $0x20] sm:$0xff]  ;;  %v148_v8 = vld [vmem:[#allocation7 + $0x18] sm:$0xff]  ;;  %v235_v19 = vand.u32 127, %v234_v17 }
  0x28   :  { %279 = vmatpush3.msra.mxu0 %v62_v1  ;;  %286 = vmatpush3.msra.mxu1 %v152_v4  ;;  %v147_v9 = vld [vmem:[#allocation7 + $0x10] sm:$0xff]  ;;  %v146_v10 = vld [vmem:[#allocation7 + $0x8] sm:$0xff]  ;;  %v145_v11 = vld [vmem:[#allocation7] sm:$0xff] }
  0x29   :  { %280 = vmatprep.subr.mxu0 %v405_v0  ;;  %287 = vmatprep.subr.mxu1 %v405_v0  ;;  %v262_v12 = vld [vmem:[%s458_s2] ss:$0 sm:$0xff]  ;;  %vm236_vm3 = vcmp.eq.s32.totalorder %v235_v19, 0  ;;  %s407_s2 = smov [#allocation8]   ;;  %vm243_vm4 = vcmp.lt.s32.totalorder %v235_v19, 2 }
  0x2a   :  { %281 = vmatpush3.msra.mxu0 %v61_v2  ;;  %288 = vmatpush3.msra.mxu1 %v151_v5  ;;  %v264_v18 = vld [vmem:[%s460_s4] ss:$0 sm:$0xff]  ;;  %s252_s11 = sshll.u32 %s407_s2, 4  ;;  %s253_s11 = int_to_ptr.vmem [resolvable:$true] %s252_s11 }
  0x2b   :  { %283 = vmatmul.mubr.msk.f32.vlgmr.msra.gmra.mxu0 %vm70_vm1, %v60_v3  ;;  %289 = vmatprep.subr.mxu1 %v405_v0  ;;  %s374_s12 = scalar_lea.vmem %s253_s11, 128  ;;  %p379_p2 = scmp.lt.s32.totalorder %s253_s11, %s253_s11 }
  0x2c   :  { %290 = vmatpush3.msra.mxu1 %v150_v6  ;;  %p375_p1 = scmp.ne.s32.totalorder %s253_s11, %s374_s12  ;;  %p380_p3 = scmp.lt.s32.totalorder %s374_s12, %s374_s12 }
  0x2d   :  { %291 = vmatprep.subr.mxu1 %v405_v0 }
  0x2e   :  { %292 = vmatpush3.msra.mxu1 %v149_v7  ;;  %p381_p4 = por %p380_p3, %p379_p2 }
  0x2f   :  { %293 = vmatprep.subr.mxu1 %v405_v0 }
  0x30   :  { %294 = vmatpush3.msra.mxu1 %v148_v8  ;;  %p382_p5 = pnand %p381_p4, %p375_p1 }
  0x31   :  { %295 = vmatprep.subr.mxu1 %v405_v0 }
  0x32   :  { %296 = vmatpush3.msra.mxu1 %v147_v9 }
  0x33   :  { %297 = vmatprep.subr.mxu1 %v405_v0 }
  0x34   :  { %298 = vmatpush3.msra.mxu1 %v146_v10 }
  0x35   :  { %299 = vmatprep.subr.mxu1 %v405_v0 }
  0x36   :  { %300 = vmatpush3.msra.mxu1 %v145_v11 }
  0xeb   :  { %v140_v13 = vpop.f32.mrf.mxu0 }
  0xec   :  { %v141_v14 = vadd.f32 %v262_v12, %v140_v13 }
  0xed   :  { %v284_v15 = vpop.f32.mrf.mxu0 }
  0xee   :  { %v144_v16 = vmax.f32 %v141_v14, 0.0 }
  0xf0   :  { %302 = vmatmul.mubr.msk.f32.vlgmr.msra.gmra.mxu1 %vm160_vm2, %v144_v16 }
 0x1b0   :  { %v230_v20 = vpop.f32.mrf.mxu1 }
 0x1b1   :  { %v231_v21 = vadd.f32 %v264_v18, %v230_v20 }
 0x1b2   :  { %v303_v22 = vpop.f32.mrf.mxu1 }
 0x1b3   :  { %v237_v23 = vmul.f32 0.5, %v231_v21 }
 0x1b5   :  { %v238_v24 = vsel %vm236_vm3, %v237_v23, %v231_v21 }
 0x1b6   :  { %312 = vtanh.f32 %v238_v24 }
 0x1c3   :  { %v313_v25 = vpop.eup %312 }
 0x1c4   :  { %v240_v26 = vadd.f32 1.0, %v313_v25 }
 0x1c6   :  { %v241_v27 = vmul.f32 0.5, %v240_v26 }
 0x1c8   :  { %v242_v28 = vsel %vm236_vm3, %v241_v27, %v313_v25 }
 0x1c9   :  { %v244_v29 = vsel %vm243_vm4, %v242_v28, %v231_v21 }
 0x1ca   :  { %245 = vst [vmem:[#allocation8] sm:$0xff] %v244_v29 }
 0x1cb   :  { %385 = shalt.err (!%p382_p5)
}
 0x1cc   :  { %255 = dma.vmem_to_hbm [thread:$0]  %s253_s11, 128, %s461_s5, [#allocation4]  }
 0x1cd   :  { %398 = dma.done.wait [#allocation4], 128  }
 0x1ce   :  { %399 = vsyncadd [#allocation4], 4294967168 }
 0x1cf   :  { %259 = vsyncpa [#allocation3], 1 }
 0x1d0   :  { %260 = vsyncpa [#allocation6], 1 }
 0x1d1   :  { %261 = vsyncpa [#allocation4], 1 }

</bundles_post_ra>
